<compile_context>
chip_gen: v7x
topology: tpu7x:2x2x1
jax: 0.10.0
libtpu: 0.0.40
codegen_flags: <defaults>
</compile_context>

<pallas_src>
import functools

import jax
import jax.numpy as jnp
from jax import lax
from jax.experimental import pallas as pl
from jax.experimental.pallas import tpu as pltpu


def _im2col_taps(pad_ref, col_ref, C, Mp, Wp):
    """Write the 9 shifted copies of pad_ref[0:C] into col_ref[0:9*C].

    pad_ref holds one image's activations in zero-bordered "padded flat"
    layout: channels on sublanes, row-major (Ho+2)x(Wo+2) spatial index on
    lanes.  For tap t = 3*dy + dx the conv input pixel of padded output
    position mp is mp + s with s = (dy-1)*Wp + (dx-1); every halo tap of a
    real output lands on a zero border lane, so each tap is ONE constant-shift
    wide copy: no validity mask, no per-tap multiplies.

    The <= Wp+1 lanes per tap that would have to be sourced from outside
    [0, Mp) belong to border output positions only; they are left untouched
    (their garbage is zeroed via `valid` before conv2 and sliced away by the
    wrapper for the final output).
    """
    for t in range(9):
        dy, dx = t // 3, t % 3
        s = (dy - 1) * Wp + (dx - 1)
        d0 = max(0, -s)                  # first destination lane
        a0 = max(0, s)                   # first source lane
        L = Mp - abs(s)
        col_ref[t * C:(t + 1) * C, d0:d0 + L] = pad_ref[0:C, a0:a0 + L]


def down_kernel(x_ref, mask_ref, w1_ref, s1_ref, b1_ref, w2_ref, s2_ref,
                b2_ref, o_ref, pad_ref, col_ref, *, Wp):
    """Fused MaxPool2d(2) -> (conv3x3 -> BN -> ReLU) x 2 for one image.

    Layout: channels on sublanes, padded-flat spatial index on lanes.
    x_ref   : (1, 4, Cin, Mp) f32  2x2 pooling phases, zero border included
    mask_ref: (1, Mp)         f32  1.0 at real pixels, 0.0 on the border
    w1_ref  : (Cmid, 9*Cin)  bf16  conv1 weights, transposed im2col layout
    s1/b1   : (Cmid, 1)       f32  folded BN1 scale / bias
    w2_ref  : (Cout, 9*Cmid) bf16  conv2 weights
    s2/b2   : (Cout, 1)       f32  folded BN2 scale / bias
    o_ref   : (1, Cout, Mp)   f32  padded-flat output (border lanes: don't care)
    pad_ref : (Cmax, Mp)     bf16  zero-bordered activations (shared scratch)
    col_ref : (9*Cmax, Mp)   bf16  im2col slab (shared scratch)
    """
    Cin = x_ref.shape[2]
    Cmid = w1_ref.shape[0]
    Mp = x_ref.shape[3]

    valid = mask_ref[...] > 0.5                            # (1, Mp)

    # ---- 2x2 max pool, stride 2: 4-way elementwise max over phases (VPU) ---
    pooled = x_ref[0, 0, :, :]
    for p in range(1, 4):
        pooled = jnp.maximum(pooled, x_ref[0, p, :, :])    # (Cin, Mp) f32
    pad_ref[0:Cin, :] = jnp.where(valid, pooled, 0.0).astype(pad_ref.dtype)

    # ---- conv1 (3x3, pad=1, no bias): one im2col matmul, then BN + ReLU ----
    _im2col_taps(pad_ref, col_ref, Cin, Mp, Wp)
    y1 = jnp.dot(w1_ref[...], col_ref[0:9 * Cin, :],
                 preferred_element_type=jnp.float32)       # (Cmid, Mp) f32
    y1 = jnp.maximum(y1 * s1_ref[...] + b1_ref[...], 0.0)
    # Stage y1 through VMEM (bounds vreg pressure) and re-zero the border so
    # conv2's halo taps read exact zeros (also kills border-lane garbage).
    pad_ref[0:Cmid, :] = jnp.where(valid, y1, 0.0).astype(pad_ref.dtype)

    # ---- conv2 (3x3, pad=1, no bias): one im2col matmul, then BN + ReLU ----
    _im2col_taps(pad_ref, col_ref, Cmid, Mp, Wp)
    y2 = jnp.dot(w2_ref[...], col_ref[0:9 * Cmid, :],
                 preferred_element_type=jnp.float32)       # (Cout, Mp) f32
    y2 = jnp.maximum(y2 * s2_ref[...] + b2_ref[...], 0.0)
    o_ref[0, :, :] = y2.astype(o_ref.dtype)


@jax.jit
def down_forward(x_nchw, w1, s1, b1, w2, s2, b2):
    """x_nchw: (N, Cin, H, W) f32 -> (N, Cout, H//2, W//2) f32. Weights HWIO."""
    N, Cin, H, W = x_nchw.shape
    assert H % 2 == 0 and W % 2 == 0, "MaxPool2d(2) assumes even H and W"
    Ho, Wo = H // 2, W // 2
    Cmid, Cout = w1.shape[3], w2.shape[3]
    Wp = Wo + 2
    Mp = (Ho + 2) * Wp                    # per-image padded-flat spatial size
    Cmax = max(Cin, Cmid)

    # Single fused XLA relayout: NCHW -> (image, pool phase, channel, padded
    # flat pixel), with a one-pixel zero border per image so the kernel's 3x3
    # taps become plain constant shifts.
    x6 = x_nchw.reshape(N, Cin, Ho, 2, Wo, 2)
    x_ph = jnp.transpose(x6, (0, 3, 5, 1, 2, 4)).reshape(N, 4, Cin, Ho, Wo)
    x_pad = jnp.pad(x_ph, ((0, 0), (0, 0), (0, 0), (1, 1), (1, 1)))
    x_pad = x_pad.reshape(N, 4, Cin, Mp)

    # Border mask in padded-flat layout (same for every image).
    m2d = jnp.zeros((Ho + 2, Wp), jnp.float32).at[1:-1, 1:-1].set(1.0)
    padmask = m2d.reshape(1, Mp)

    # Transposed im2col weight layout, bf16 for the MXU.
    w1t = jnp.transpose(w1.reshape(9 * Cin, Cmid)).astype(jnp.bfloat16)
    w2t = jnp.transpose(w2.reshape(9 * Cmid, Cout)).astype(jnp.bfloat16)
    s1c = s1.reshape(Cmid, 1)
    b1c = b1.reshape(Cmid, 1)
    s2c = s2.reshape(Cout, 1)
    b2c = b2.reshape(Cout, 1)

    flops = 2 * N * Ho * Wo * 9 * (Cin * Cmid + Cmid * Cout)
    bytes_accessed = (x_pad.size * 4 + N * Cout * Mp * 4
                      + (w1t.size + w2t.size) * 2
                      + 2 * (Cmid + Cout) * 4 + Mp * 4)

    # Per-step VMEM: double-buffered x/out tiles + resident weights + the two
    # shared bf16 scratches; generous headroom, clamped under v7x's 64 MiB.
    step_bytes = (2 * (4 * Cin * Mp * 4 + Cout * Mp * 4)
                  + (w1t.size + w2t.size) * 2 + Mp * 4 + 2 * (Cmid + Cout) * 4
                  + Cmax * Mp * 2 + 9 * Cmax * Mp * 2)
    vmem_limit = int(min(max(4 * step_bytes, 16 * 1024 * 1024),
                         48 * 1024 * 1024))

    kernel = functools.partial(down_kernel, Wp=Wp)
    out_pad = pl.pallas_call(
        kernel,
        out_shape=jax.ShapeDtypeStruct((N, Cout, Mp), jnp.float32),
        grid=(N,),
        in_specs=[
            pl.BlockSpec((1, 4, Cin, Mp), lambda n: (n, 0, 0, 0)),
            pl.BlockSpec((1, Mp), lambda n: (0, 0)),
            pl.BlockSpec((Cmid, 9 * Cin), lambda n: (0, 0)),
            pl.BlockSpec((Cmid, 1), lambda n: (0, 0)),
            pl.BlockSpec((Cmid, 1), lambda n: (0, 0)),
            pl.BlockSpec((Cout, 9 * Cmid), lambda n: (0, 0)),
            pl.BlockSpec((Cout, 1), lambda n: (0, 0)),
            pl.BlockSpec((Cout, 1), lambda n: (0, 0)),
        ],
        out_specs=pl.BlockSpec((1, Cout, Mp), lambda n: (n, 0, 0)),
        scratch_shapes=[
            pltpu.VMEM((Cmax, Mp), jnp.bfloat16),
            pltpu.VMEM((9 * Cmax, Mp), jnp.bfloat16),
        ],
        compiler_params=pltpu.CompilerParams(
            dimension_semantics=("parallel",),
            vmem_limit_bytes=vmem_limit),
        cost_estimate=pl.CostEstimate(flops=flops, transcendentals=0,
                                      bytes_accessed=bytes_accessed),
    )(x_pad, padmask, w1t, s1c, b1c, w2t, s2c, b2c)

    # Drop the one-pixel border; channels already sit in the NCHW position.
    out = out_pad.reshape(N, Cout, Ho + 2, Wp)[:, :, 1:-1, 1:-1]
    return out


def reference_forward(x_nchw, w1, s1, b1, w2, s2, b2):
    """Plain-JAX reference (NHWC internally), for correctness checking."""
    x = jnp.transpose(x_nchw, (0, 2, 3, 1))
    p = lax.reduce_window(x, -jnp.inf, lax.max,
                          (1, 2, 2, 1), (1, 2, 2, 1), "VALID")
    dn = ("NHWC", "HWIO", "NHWC")
    y = lax.conv_general_dilated(p, w1, (1, 1), "SAME", dimension_numbers=dn)
    y = jnp.maximum(y * s1[0] + b1[0], 0.0)
    y = lax.conv_general_dilated(y, w2, (1, 1), "SAME", dimension_numbers=dn)
    y = jnp.maximum(y * s2[0] + b2[0], 0.0)
    return jnp.transpose(y, (0, 3, 1, 2))


def make_params(key, c_in, c_out):
    """Deterministic synthetic parameters (DoubleConv with mid = out)."""
    c_mid = c_out
    eps = 1e-5
    ks = jax.random.split(key, 10)
    # Conv weights in HWIO (parameters are synthetic, so the layout is ours).
    w1 = jax.random.normal(ks[0], (3, 3, c_in, c_mid), jnp.float32) * 0.1
    w2 = jax.random.normal(ks[1], (3, 3, c_mid, c_out), jnp.float32) * 0.1
    # BatchNorm (eval mode): fold gamma/beta/running stats to scale/bias.
    g1 = 1.0 + 0.1 * jax.random.normal(ks[2], (c_mid,), jnp.float32)
    be1 = 0.1 * jax.random.normal(ks[3], (c_mid,), jnp.float32)
    m1 = 0.1 * jax.random.normal(ks[4], (c_mid,), jnp.float32)
    v1 = jax.random.uniform(ks[5], (c_mid,), jnp.float32, 0.5, 1.5)
    g2 = 1.0 + 0.1 * jax.random.normal(ks[6], (c_out,), jnp.float32)
    be2 = 0.1 * jax.random.normal(ks[7], (c_out,), jnp.float32)
    m2 = 0.1 * jax.random.normal(ks[8], (c_out,), jnp.float32)
    v2 = jax.random.uniform(ks[9], (c_out,), jnp.float32, 0.5, 1.5)
    s1 = (g1 / jnp.sqrt(v1 + eps)).reshape(1, c_mid)
    b1 = (be1 - m1 * g1 / jnp.sqrt(v1 + eps)).reshape(1, c_mid)
    s2 = (g2 / jnp.sqrt(v2 + eps)).reshape(1, c_out)
    b2 = (be2 - m2 * g2 / jnp.sqrt(v2 + eps)).reshape(1, c_out)
    return w1, s1, b1, w2, s2, b2


if __name__ == "__main__":
    key = jax.random.PRNGKey(0)
    k_x, k_p = jax.random.split(key)

    N, C_IN, H, W = 2, 4, 16, 16
    C_OUT = 8

    x = jax.random.normal(k_x, (N, C_IN, H, W), jnp.float32)  # NCHW like PyTorch
    w1, s1, b1, w2, s2, b2 = make_params(k_p, C_IN, C_OUT)
    # Quantize conv weights to bf16-representable values so the only kernel /
    # reference difference is the bf16 rounding of the im2col activations.
    w1 = w1.astype(jnp.bfloat16).astype(jnp.float32)
    w2 = w2.astype(jnp.bfloat16).astype(jnp.float32)

    out = jax.block_until_ready(down_forward(x, w1, s1, b1, w2, s2, b2))
    ref = reference_forward(x, w1, s1, b1, w2, s2, b2)

    assert out.shape == (N, C_OUT, H // 2, W // 2), out.shape
    assert bool(jnp.all(jnp.isfinite(out))), "non-finite output"
    max_err = float(jnp.max(jnp.abs(out - ref)))
    # bf16 MXU operands with f32 accumulation -> tolerance loosened per review.
    assert jnp.allclose(out, ref, atol=5e-2, rtol=5e-2), max_err

    print("KERNEL_OK")
</pallas_src>

<mosaic_0001>
module attributes {stable_mosaic.version = 11 : i64} {
  func.func @down_kernel(%arg0: i32, %arg1: memref<1x4x4x100xf32, #tpu.memory_space<vmem>>, %arg2: memref<1x100xf32, #tpu.memory_space<vmem>>, %arg3: memref<8x36xbf16, #tpu.memory_space<vmem>>, %arg4: memref<8x1xf32, #tpu.memory_space<vmem>>, %arg5: memref<8x1xf32, #tpu.memory_space<vmem>>, %arg6: memref<8x72xbf16, #tpu.memory_space<vmem>>, %arg7: memref<8x1xf32, #tpu.memory_space<vmem>>, %arg8: memref<8x1xf32, #tpu.memory_space<vmem>>, %arg9: memref<1x8x100xf32, #tpu.memory_space<vmem>>, %arg10: memref<8x100xbf16, #tpu.memory_space<vmem>>, %arg11: memref<72x100xbf16, #tpu.memory_space<vmem>>) attributes {dimension_semantics = [#tpu.dimension_semantics<parallel>], iteration_bounds = array<i64: 2>, scalar_prefetch = 0 : i64, scratch_operands = 2 : i64, tpu.core_type = #tpu.core_type<tc>, window_params = [{transform_indices = @transform_0, window_bounds = array<i64: 1, 4, 4, 100>}, {pipeline_mode = #tpu.pipeline_mode<synchronous>, transform_indices = @transform_1, window_bounds = array<i64: 1, 100>}, {pipeline_mode = #tpu.pipeline_mode<synchronous>, transform_indices = @transform_2, window_bounds = array<i64: 8, 36>}, {pipeline_mode = #tpu.pipeline_mode<synchronous>, transform_indices = @transform_3, window_bounds = array<i64: 8, 1>}, {pipeline_mode = #tpu.pipeline_mode<synchronous>, transform_indices = @transform_4, window_bounds = array<i64: 8, 1>}, {pipeline_mode = #tpu.pipeline_mode<synchronous>, transform_indices = @transform_5, window_bounds = array<i64: 8, 72>}, {pipeline_mode = #tpu.pipeline_mode<synchronous>, transform_indices = @transform_6, window_bounds = array<i64: 8, 1>}, {pipeline_mode = #tpu.pipeline_mode<synchronous>, transform_indices = @transform_7, window_bounds = array<i64: 8, 1>}, {transform_indices = @transform_8, window_bounds = array<i64: 1, 8, 100>}]} {
    %c0 = arith.constant 0 : index
    %c0_0 = arith.constant 0 : index
    %0 = vector.load %arg2[%c0, %c0_0] : memref<1x100xf32, #tpu.memory_space<vmem>>, vector<1x100xf32>
    %cst = arith.constant 5.000000e-01 : f32
    %1 = vector.broadcast %cst : f32 to vector<1x100xf32>
    %2 = arith.cmpf ogt, %0, %1 : vector<1x100xf32>
    %c0_1 = arith.constant 0 : index
    %c0_2 = arith.constant 0 : index
    %c0_3 = arith.constant 0 : index
    %c0_4 = arith.constant 0 : index
    %3 = vector.load %arg1[%c0_1, %c0_2, %c0_3, %c0_4] : memref<1x4x4x100xf32, #tpu.memory_space<vmem>>, vector<1x1x4x100xf32>
    %4 = vector.shape_cast %3 : vector<1x1x4x100xf32> to vector<4x100xf32>
    %c0_5 = arith.constant 0 : index
    %c1 = arith.constant 1 : index
    %c0_6 = arith.constant 0 : index
    %c0_7 = arith.constant 0 : index
    %5 = vector.load %arg1[%c0_5, %c1, %c0_6, %c0_7] : memref<1x4x4x100xf32, #tpu.memory_space<vmem>>, vector<1x1x4x100xf32>
    %6 = vector.shape_cast %5 : vector<1x1x4x100xf32> to vector<4x100xf32>
    %7 = arith.maximumf %4, %6 : vector<4x100xf32>
    %c0_8 = arith.constant 0 : index
    %c2 = arith.constant 2 : index
    %c0_9 = arith.constant 0 : index
    %c0_10 = arith.constant 0 : index
    %8 = vector.load %arg1[%c0_8, %c2, %c0_9, %c0_10] : memref<1x4x4x100xf32, #tpu.memory_space<vmem>>, vector<1x1x4x100xf32>
    %9 = vector.shape_cast %8 : vector<1x1x4x100xf32> to vector<4x100xf32>
    %10 = arith.maximumf %7, %9 : vector<4x100xf32>
    %c0_11 = arith.constant 0 : index
    %c3 = arith.constant 3 : index
    %c0_12 = arith.constant 0 : index
    %c0_13 = arith.constant 0 : index
    %11 = vector.load %arg1[%c0_11, %c3, %c0_12, %c0_13] : memref<1x4x4x100xf32, #tpu.memory_space<vmem>>, vector<1x1x4x100xf32>
    %12 = vector.shape_cast %11 : vector<1x1x4x100xf32> to vector<4x100xf32>
    %13 = arith.maximumf %10, %12 : vector<4x100xf32>
    %cst_14 = arith.constant 0.000000e+00 : f32
    %14 = vector.shape_cast %2 : vector<1x100xi1> to vector<1x100xi1>
    %15 = vector.broadcast %14 : vector<1x100xi1> to vector<4x100xi1>
    %16 = vector.broadcast %cst_14 : f32 to vector<4x100xf32>
    %17 = arith.select %15, %13, %16 : vector<4x100xi1>, vector<4x100xf32>
    %18 = arith.truncf %17 : vector<4x100xf32> to vector<4x100xbf16>
    %c0_15 = arith.constant 0 : index
    %c0_16 = arith.constant 0 : index
    %19 = vector.load %arg10[%c0_15, %c0_16] : memref<8x100xbf16, #tpu.memory_space<vmem>>, vector<4x100xbf16>
    tpu.vector_store %arg10[%c0_15, %c0_16], %18 {strides = array<i32>} : memref<8x100xbf16, #tpu.memory_space<vmem>>, vector<4x100xbf16>,
    %c0_17 = arith.constant 0 : index
    %c0_18 = arith.constant 0 : index
    %20 = vector.load %arg10[%c0_17, %c0_18] : memref<8x100xbf16, #tpu.memory_space<vmem>>, vector<4x89xbf16>
    %c0_19 = arith.constant 0 : index
    %c11 = arith.constant 11 : index
    %21 = vector.load %arg11[%c0_19, %c11] : memref<72x100xbf16, #tpu.memory_space<vmem>>, vector<4x89xbf16>
    tpu.vector_store %arg11[%c0_19, %c11], %20 {strides = array<i32>} : memref<72x100xbf16, #tpu.memory_space<vmem>>, vector<4x89xbf16>,
    %c0_20 = arith.constant 0 : index
    %c0_21 = arith.constant 0 : index
    %22 = vector.load %arg10[%c0_20, %c0_21] : memref<8x100xbf16, #tpu.memory_space<vmem>>, vector<4x90xbf16>
    %c4 = arith.constant 4 : index
    %c10 = arith.constant 10 : index
    %23 = vector.load %arg11[%c4, %c10] : memref<72x100xbf16, #tpu.memory_space<vmem>>, vector<4x90xbf16>
    tpu.vector_store %arg11[%c4, %c10], %22 {strides = array<i32>} : memref<72x100xbf16, #tpu.memory_space<vmem>>, vector<4x90xbf16>,
    %c0_22 = arith.constant 0 : index
    %c0_23 = arith.constant 0 : index
    %24 = vector.load %arg10[%c0_22, %c0_23] : memref<8x100xbf16, #tpu.memory_space<vmem>>, vector<4x91xbf16>
    %c8 = arith.constant 8 : index
    %c9 = arith.constant 9 : index
    %25 = vector.load %arg11[%c8, %c9] : memref<72x100xbf16, #tpu.memory_space<vmem>>, vector<4x91xbf16>
    tpu.vector_store %arg11[%c8, %c9], %24 {strides = array<i32>} : memref<72x100xbf16, #tpu.memory_space<vmem>>, vector<4x91xbf16>,
    %c0_24 = arith.constant 0 : index
    %c0_25 = arith.constant 0 : index
    %26 = vector.load %arg10[%c0_24, %c0_25] : memref<8x100xbf16, #tpu.memory_space<vmem>>, vector<4x99xbf16>
    %c12 = arith.constant 12 : index
    %c1_26 = arith.constant 1 : index
    %27 = vector.load %arg11[%c12, %c1_26] : memref<72x100xbf16, #tpu.memory_space<vmem>>, vector<4x99xbf16>
    tpu.vector_store %arg11[%c12, %c1_26], %26 {strides = array<i32>} : memref<72x100xbf16, #tpu.memory_space<vmem>>, vector<4x99xbf16>,
    %c0_27 = arith.constant 0 : index
    %c0_28 = arith.constant 0 : index
    %28 = vector.load %arg10[%c0_27, %c0_28] : memref<8x100xbf16, #tpu.memory_space<vmem>>, vector<4x100xbf16>
    %c16 = arith.constant 16 : index
    %c0_29 = arith.constant 0 : index
    %29 = vector.load %arg11[%c16, %c0_29] : memref<72x100xbf16, #tpu.memory_space<vmem>>, vector<4x100xbf16>
    tpu.vector_store %arg11[%c16, %c0_29], %28 {strides = array<i32>} : memref<72x100xbf16, #tpu.memory_space<vmem>>, vector<4x100xbf16>,
    %c0_30 = arith.constant 0 : index
    %c1_31 = arith.constant 1 : index
    %30 = vector.load %arg10[%c0_30, %c1_31] : memref<8x100xbf16, #tpu.memory_space<vmem>>, vector<4x99xbf16>
    %c20 = arith.constant 20 : index
    %c0_32 = arith.constant 0 : index
    %31 = vector.load %arg11[%c20, %c0_32] : memref<72x100xbf16, #tpu.memory_space<vmem>>, vector<4x99xbf16>
    tpu.vector_store %arg11[%c20, %c0_32], %30 {strides = array<i32>} : memref<72x100xbf16, #tpu.memory_space<vmem>>, vector<4x99xbf16>,
    %c0_33 = arith.constant 0 : index
    %c9_34 = arith.constant 9 : index
    %32 = vector.load %arg10[%c0_33, %c9_34] : memref<8x100xbf16, #tpu.memory_space<vmem>>, vector<4x91xbf16>
    %c24 = arith.constant 24 : index
    %c0_35 = arith.constant 0 : index
    %33 = vector.load %arg11[%c24, %c0_35] : memref<72x100xbf16, #tpu.memory_space<vmem>>, vector<4x91xbf16>
    tpu.vector_store %arg11[%c24, %c0_35], %32 {strides = array<i32>} : memref<72x100xbf16, #tpu.memory_space<vmem>>, vector<4x91xbf16>,
    %c0_36 = arith.constant 0 : index
    %c10_37 = arith.constant 10 : index
    %34 = vector.load %arg10[%c0_36, %c10_37] : memref<8x100xbf16, #tpu.memory_space<vmem>>, vector<4x90xbf16>
    %c28 = arith.constant 28 : index
    %c0_38 = arith.constant 0 : index
    %35 = vector.load %arg11[%c28, %c0_38] : memref<72x100xbf16, #tpu.memory_space<vmem>>, vector<4x90xbf16>
    tpu.vector_store %arg11[%c28, %c0_38], %34 {strides = array<i32>} : memref<72x100xbf16, #tpu.memory_space<vmem>>, vector<4x90xbf16>,
    %c0_39 = arith.constant 0 : index
    %c11_40 = arith.constant 11 : index
    %36 = vector.load %arg10[%c0_39, %c11_40] : memref<8x100xbf16, #tpu.memory_space<vmem>>, vector<4x89xbf16>
    %c32 = arith.constant 32 : index
    %c0_41 = arith.constant 0 : index
    %37 = vector.load %arg11[%c32, %c0_41] : memref<72x100xbf16, #tpu.memory_space<vmem>>, vector<4x89xbf16>
    tpu.vector_store %arg11[%c32, %c0_41], %36 {strides = array<i32>} : memref<72x100xbf16, #tpu.memory_space<vmem>>, vector<4x89xbf16>,
    %c0_42 = arith.constant 0 : index
    %c0_43 = arith.constant 0 : index
    %38 = vector.load %arg3[%c0_42, %c0_43] : memref<8x36xbf16, #tpu.memory_space<vmem>>, vector<8x36xbf16>
    %c0_44 = arith.constant 0 : index
    %c0_45 = arith.constant 0 : index
    %39 = vector.load %arg11[%c0_44, %c0_45] : memref<72x100xbf16, #tpu.memory_space<vmem>>, vector<36x100xbf16>
    %cst_46 = arith.constant dense<0.000000e+00> : vector<8x100xf32>
    %40 = tpu.matmul %38, %39, %cst_46 {dimension_numbers = #tpu.dot_dimension_numbers<[1], [0], [0], [1], [0, 0, 1, 1], [], []>} : vector<8x36xbf16>, vector<36x100xbf16>, vector<8x100xf32> -> vector<8x100xf32>
    %c0_47 = arith.constant 0 : index
    %c0_48 = arith.constant 0 : index
    %41 = vector.load %arg4[%c0_47, %c0_48] : memref<8x1xf32, #tpu.memory_space<vmem>>, vector<8x1xf32>
    %42 = vector.broadcast %41 : vector<8x1xf32> to vector<8x100xf32>
    %43 = arith.mulf %40, %42 : vector<8x100xf32>
    %c0_49 = arith.constant 0 : index
    %c0_50 = arith.constant 0 : index
    %44 = vector.load %arg5[%c0_49, %c0_50] : memref<8x1xf32, #tpu.memory_space<vmem>>, vector<8x1xf32>
    %45 = vector.broadcast %44 : vector<8x1xf32> to vector<8x100xf32>
    %46 = arith.addf %43, %45 : vector<8x100xf32>
    %cst_51 = arith.constant 0.000000e+00 : f32
    %47 = vector.broadcast %cst_51 : f32 to vector<8x100xf32>
    %48 = arith.maximumf %46, %47 : vector<8x100xf32>
    %cst_52 = arith.constant 0.000000e+00 : f32
    %49 = vector.shape_cast %2 : vector<1x100xi1> to vector<1x100xi1>
    %50 = vector.broadcast %49 : vector<1x100xi1> to vector<8x100xi1>
    %51 = vector.broadcast %cst_52 : f32 to vector<8x100xf32>
    %52 = arith.select %50, %48, %51 : vector<8x100xi1>, vector<8x100xf32>
    %53 = arith.truncf %52 : vector<8x100xf32> to vector<8x100xbf16>
    %c0_53 = arith.constant 0 : index
    %c0_54 = arith.constant 0 : index
    %54 = vector.load %arg10[%c0_53, %c0_54] : memref<8x100xbf16, #tpu.memory_space<vmem>>, vector<8x100xbf16>
    tpu.vector_store %arg10[%c0_53, %c0_54], %53 {strides = array<i32>} : memref<8x100xbf16, #tpu.memory_space<vmem>>, vector<8x100xbf16>,
    %c0_55 = arith.constant 0 : index
    %c0_56 = arith.constant 0 : index
    %55 = vector.load %arg10[%c0_55, %c0_56] : memref<8x100xbf16, #tpu.memory_space<vmem>>, vector<8x89xbf16>
    %c0_57 = arith.constant 0 : index
    %c11_58 = arith.constant 11 : index
    %56 = vector.load %arg11[%c0_57, %c11_58] : memref<72x100xbf16, #tpu.memory_space<vmem>>, vector<8x89xbf16>
    tpu.vector_store %arg11[%c0_57, %c11_58], %55 {strides = array<i32>} : memref<72x100xbf16, #tpu.memory_space<vmem>>, vector<8x89xbf16>,
    %c0_59 = arith.constant 0 : index
    %c0_60 = arith.constant 0 : index
    %57 = vector.load %arg10[%c0_59, %c0_60] : memref<8x100xbf16, #tpu.memory_space<vmem>>, vector<8x90xbf16>
    %c8_61 = arith.constant 8 : index
    %c10_62 = arith.constant 10 : index
    %58 = vector.load %arg11[%c8_61, %c10_62] : memref<72x100xbf16, #tpu.memory_space<vmem>>, vector<8x90xbf16>
    tpu.vector_store %arg11[%c8_61, %c10_62], %57 {strides = array<i32>} : memref<72x100xbf16, #tpu.memory_space<vmem>>, vector<8x90xbf16>,
    %c0_63 = arith.constant 0 : index
    %c0_64 = arith.constant 0 : index
    %59 = vector.load %arg10[%c0_63, %c0_64] : memref<8x100xbf16, #tpu.memory_space<vmem>>, vector<8x91xbf16>
    %c16_65 = arith.constant 16 : index
    %c9_66 = arith.constant 9 : index
    %60 = vector.load %arg11[%c16_65, %c9_66] : memref<72x100xbf16, #tpu.memory_space<vmem>>, vector<8x91xbf16>
    tpu.vector_store %arg11[%c16_65, %c9_66], %59 {strides = array<i32>} : memref<72x100xbf16, #tpu.memory_space<vmem>>, vector<8x91xbf16>,
    %c0_67 = arith.constant 0 : index
    %c0_68 = arith.constant 0 : index
    %61 = vector.load %arg10[%c0_67, %c0_68] : memref<8x100xbf16, #tpu.memory_space<vmem>>, vector<8x99xbf16>
    %c24_69 = arith.constant 24 : index
    %c1_70 = arith.constant 1 : index
    %62 = vector.load %arg11[%c24_69, %c1_70] : memref<72x100xbf16, #tpu.memory_space<vmem>>, vector<8x99xbf16>
    tpu.vector_store %arg11[%c24_69, %c1_70], %61 {strides = array<i32>} : memref<72x100xbf16, #tpu.memory_space<vmem>>, vector<8x99xbf16>,
    %c0_71 = arith.constant 0 : index
    %c0_72 = arith.constant 0 : index
    %63 = vector.load %arg10[%c0_71, %c0_72] : memref<8x100xbf16, #tpu.memory_space<vmem>>, vector<8x100xbf16>
    %c32_73 = arith.constant 32 : index
    %c0_74 = arith.constant 0 : index
    %64 = vector.load %arg11[%c32_73, %c0_74] : memref<72x100xbf16, #tpu.memory_space<vmem>>, vector<8x100xbf16>
    tpu.vector_store %arg11[%c32_73, %c0_74], %63 {strides = array<i32>} : memref<72x100xbf16, #tpu.memory_space<vmem>>, vector<8x100xbf16>,
    %c0_75 = arith.constant 0 : index
    %c1_76 = arith.constant 1 : index
    %65 = vector.load %arg10[%c0_75, %c1_76] : memref<8x100xbf16, #tpu.memory_space<vmem>>, vector<8x99xbf16>
    %c40 = arith.constant 40 : index
    %c0_77 = arith.constant 0 : index
    %66 = vector.load %arg11[%c40, %c0_77] : memref<72x100xbf16, #tpu.memory_space<vmem>>, vector<8x99xbf16>
    tpu.vector_store %arg11[%c40, %c0_77], %65 {strides = array<i32>} : memref<72x100xbf16, #tpu.memory_space<vmem>>, vector<8x99xbf16>,
    %c0_78 = arith.constant 0 : index
    %c9_79 = arith.constant 9 : index
    %67 = vector.load %arg10[%c0_78, %c9_79] : memref<8x100xbf16, #tpu.memory_space<vmem>>, vector<8x91xbf16>
    %c48 = arith.constant 48 : index
    %c0_80 = arith.constant 0 : index
    %68 = vector.load %arg11[%c48, %c0_80] : memref<72x100xbf16, #tpu.memory_space<vmem>>, vector<8x91xbf16>
    tpu.vector_store %arg11[%c48, %c0_80], %67 {strides = array<i32>} : memref<72x100xbf16, #tpu.memory_space<vmem>>, vector<8x91xbf16>,
    %c0_81 = arith.constant 0 : index
    %c10_82 = arith.constant 10 : index
    %69 = vector.load %arg10[%c0_81, %c10_82] : memref<8x100xbf16, #tpu.memory_space<vmem>>, vector<8x90xbf16>
    %c56 = arith.constant 56 : index
    %c0_83 = arith.constant 0 : index
    %70 = vector.load %arg11[%c56, %c0_83] : memref<72x100xbf16, #tpu.memory_space<vmem>>, vector<8x90xbf16>
    tpu.vector_store %arg11[%c56, %c0_83], %69 {strides = array<i32>} : memref<72x100xbf16, #tpu.memory_space<vmem>>, vector<8x90xbf16>,
    %c0_84 = arith.constant 0 : index
    %c11_85 = arith.constant 11 : index
    %71 = vector.load %arg10[%c0_84, %c11_85] : memref<8x100xbf16, #tpu.memory_space<vmem>>, vector<8x89xbf16>
    %c64 = arith.constant 64 : index
    %c0_86 = arith.constant 0 : index
    %72 = vector.load %arg11[%c64, %c0_86] : memref<72x100xbf16, #tpu.memory_space<vmem>>, vector<8x89xbf16>
    tpu.vector_store %arg11[%c64, %c0_86], %71 {strides = array<i32>} : memref<72x100xbf16, #tpu.memory_space<vmem>>, vector<8x89xbf16>,
    %c0_87 = arith.constant 0 : index
    %c0_88 = arith.constant 0 : index
    %73 = vector.load %arg6[%c0_87, %c0_88] : memref<8x72xbf16, #tpu.memory_space<vmem>>, vector<8x72xbf16>
    %c0_89 = arith.constant 0 : index
    %c0_90 = arith.constant 0 : index
    %74 = vector.load %arg11[%c0_89, %c0_90] : memref<72x100xbf16, #tpu.memory_space<vmem>>, vector<72x100xbf16>
    %cst_91 = arith.constant dense<0.000000e+00> : vector<8x100xf32>
    %75 = tpu.matmul %73, %74, %cst_91 {dimension_numbers = #tpu.dot_dimension_numbers<[1], [0], [0], [1], [0, 0, 1, 1], [], []>} : vector<8x72xbf16>, vector<72x100xbf16>, vector<8x100xf32> -> vector<8x100xf32>
    %c0_92 = arith.constant 0 : index
    %c0_93 = arith.constant 0 : index
    %76 = vector.load %arg7[%c0_92, %c0_93] : memref<8x1xf32, #tpu.memory_space<vmem>>, vector<8x1xf32>
    %77 = vector.broadcast %76 : vector<8x1xf32> to vector<8x100xf32>
    %78 = arith.mulf %75, %77 : vector<8x100xf32>
    %c0_94 = arith.constant 0 : index
    %c0_95 = arith.constant 0 : index
    %79 = vector.load %arg8[%c0_94, %c0_95] : memref<8x1xf32, #tpu.memory_space<vmem>>, vector<8x1xf32>
    %80 = vector.broadcast %79 : vector<8x1xf32> to vector<8x100xf32>
    %81 = arith.addf %78, %80 : vector<8x100xf32>
    %cst_96 = arith.constant 0.000000e+00 : f32
    %82 = vector.broadcast %cst_96 : f32 to vector<8x100xf32>
    %83 = arith.maximumf %81, %82 : vector<8x100xf32>
    %c0_97 = arith.constant 0 : index
    %c0_98 = arith.constant 0 : index
    %c0_99 = arith.constant 0 : index
    %84 = vector.load %arg9[%c0_97, %c0_98, %c0_99] : memref<1x8x100xf32, #tpu.memory_space<vmem>>, vector<1x8x100xf32>
    %85 = vector.shape_cast %84 : vector<1x8x100xf32> to vector<8x100xf32>
    %86 = vector.shape_cast %83 : vector<8x100xf32> to vector<1x8x100xf32>
    tpu.vector_store %arg9[%c0_97, %c0_98, %c0_99], %86 {strides = array<i32>} : memref<1x8x100xf32, #tpu.memory_space<vmem>>, vector<1x8x100xf32>,
    return
  }
  func.func @transform_0(%arg0: i32) -> (i32, i32, i32, i32) {
    %c0_i32 = arith.constant 0 : i32
    %c0_i32_0 = arith.constant 0 : i32
    %c0_i32_1 = arith.constant 0 : i32
    %c0_i32_2 = arith.constant 0 : i32
    return %arg0, %c0_i32, %c0_i32_0, %c0_i32_1 : i32, i32, i32, i32
  }
  func.func @transform_1(%arg0: i32) -> (i32, i32) {
    %c0_i32 = arith.constant 0 : i32
    %c0_i32_0 = arith.constant 0 : i32
    %c0_i32_1 = arith.constant 0 : i32
    return %c0_i32, %c0_i32_0 : i32, i32
  }
  func.func @transform_2(%arg0: i32) -> (i32, i32) {
    %c0_i32 = arith.constant 0 : i32
    %c0_i32_0 = arith.constant 0 : i32
    %c0_i32_1 = arith.constant 0 : i32
    return %c0_i32, %c0_i32_0 : i32, i32
  }
  func.func @transform_3(%arg0: i32) -> (i32, i32) {
    %c0_i32 = arith.constant 0 : i32
    %c0_i32_0 = arith.constant 0 : i32
    %c0_i32_1 = arith.constant 0 : i32
    return %c0_i32, %c0_i32_0 : i32, i32
  }
  func.func @transform_4(%arg0: i32) -> (i32, i32) {
    %c0_i32 = arith.constant 0 : i32
    %c0_i32_0 = arith.constant 0 : i32
    %c0_i32_1 = arith.constant 0 : i32
    return %c0_i32, %c0_i32_0 : i32, i32
  }
  func.func @transform_5(%arg0: i32) -> (i32, i32) {
    %c0_i32 = arith.constant 0 : i32
    %c0_i32_0 = arith.constant 0 : i32
    %c0_i32_1 = arith.constant 0 : i32
    return %c0_i32, %c0_i32_0 : i32, i32
  }
  func.func @transform_6(%arg0: i32) -> (i32, i32) {
    %c0_i32 = arith.constant 0 : i32
    %c0_i32_0 = arith.constant 0 : i32
    %c0_i32_1 = arith.constant 0 : i32
    return %c0_i32, %c0_i32_0 : i32, i32
  }
  func.func @transform_7(%arg0: i32) -> (i32, i32) {
    %c0_i32 = arith.constant 0 : i32
    %c0_i32_0 = arith.constant 0 : i32
    %c0_i32_1 = arith.constant 0 : i32
    return %c0_i32, %c0_i32_0 : i32, i32
  }
  func.func @transform_8(%arg0: i32) -> (i32, i32, i32) {
    %c0_i32 = arith.constant 0 : i32
    %c0_i32_0 = arith.constant 0 : i32
    %c0_i32_1 = arith.constant 0 : i32
    return %arg0, %c0_i32, %c0_i32_0 : i32, i32, i32
  }
}

</mosaic_0001>

<bundles_post_ra>
// kernel: down_forward.1
= control target key start
LH: loop header
LB: loop body
LE: loop exit
PB: predicated region body
PF: predicated region fallthrough
CT: control target
= control target key end

     0   :  { %s841_s27 = smov 0   ;;  %s916_s0 = inlined_call_operand.vmem [shape: f32[2,4,4,100], index: 0, kind: input, shape index: {}]   ;;  %s917_s1 = inlined_call_operand.vmem [shape: f32[1,100], index: 1, kind: input, shape index: {}]   ;;  %s918_s2 = inlined_call_operand.vmem [shape: bf16[8,36], index: 2, kind: input, shape index: {}]   ;;  %s919_s3 = inlined_call_operand.vmem [shape: f32[8,1], index: 3, kind: input, shape index: {}]   ;;  %s920_s4 = inlined_call_operand.vmem [shape: f32[8,1], index: 4, kind: input, shape index: {}]   ;;  %s921_s5 = inlined_call_operand.vmem [shape: bf16[8,72], index: 5, kind: input, shape index: {}]   ;;  %s922_s6 = inlined_call_operand.vmem [shape: f32[8,1], index: 6, kind: input, shape index: {}]   ;;  %s923_s7 = inlined_call_operand.vmem [shape: f32[8,1], index: 7, kind: input, shape index: {}]   ;;  %s924_s8 = inlined_call_operand.vmem [shape: f32[2,8,100], index: 8, kind: output, shape index: {}]  }
   0x1 LB: > { %s690_s28 = sadd.s32 4294967295, %s783_s27   ;;  %p694_p0 = scmp.ge.s32.totalorder %s783_s27, 1  ;;  %s783_s27 = sphi %s841_s27, %s18_s27  }
   0x2   : > { %p262_p1 = scmp.lt.s32.totalorder %s783_s27, 3 }
   0x4   : > { %p263_p2 = pnand %p694_p0, %p262_p1 }
   0x5   : > { %p295_p3 = scmp.lt.s32.totalorder (!%p263_p2), %s690_s28, 1  ;;  %v305_v0 = vld [vmem:[%s917_s1] sm:$0x1] (!%p263_p2)  ;;  %v318_v1 = vlaneseq (!%p263_p2)  ;;  %v785_v2 = vmov (!%p263_p2), 0   ;;  %vm325_vm2 = vcmask (!%p263_p2), 812032   ;;  %v786_v19 = vmov (!%p263_p2), 0.0  }
   0x6   : > { %266 = sbr.rel (%p263_p2) target bundleno = 769 (0x301), region = 52  ;;  %vm306_vm0 = vcmp.gt.f32.partialorder (!%p263_p2), %v305_v0, 0.5  ;;  %767 = vset.pattern.permute.xlu0 (!%p263_p2), %v785_v2  ;;  %768 = vset.pattern.permute.xlu1 (!%p263_p2), %v785_v2  ;;  %s787_s13 = smov (!%p263_p2), 9   ;;  %vm795_vm3 = vmmov (!%p263_p2), 0   ;;  %v458_v30 = vld [vmem:[%s919_s3] sm:$0xff] (!%p263_p2)  ;;  %vm347_vm4 = vcmask (!%p263_p2), 812104  }
   0x7   : > { %v319_v3 = vshrl.u32 (!%p263_p2), %v318_v1, 7  ;;  %v317_v4 = vsel (!%p263_p2), %vm306_vm0, 1, %v785_v2  ;;  %724 = vmatprep.subr.bf16.mxu0 (!%p263_p2), %v786_v19  ;;  %734 = vmatprep.subr.bf16.mxu1 (!%p263_p2), %v786_v19  ;;  %s788_s14 = smov (!%p263_p2), 11   ;;  %s789_s15 = smov (!%p263_p2), 1   ;;  %v465_v31 = vld [vmem:[%s920_s4] sm:$0xff] (!%p263_p2)  ;;  %vm332_vm5 = vcmask (!%p263_p2), 812120  }
   0x8   : > { %s790_s16 = smov (!%p263_p2), 10   ;;  %s791_s17 = smov (!%p263_p2), 127   ;;  %730 = vmatprep.mubr.msk.bf16.mxu0 (!%p263_p2), %vm795_vm3, %v786_v19  ;;  %744 = vmatprep.mubr.msk.bf16.mxu1 (!%p263_p2), %vm795_vm3, %v786_v19  ;;  %vm355_vm6 = vcmask (!%p263_p2), 814090   ;;  %vm340_vm7 = vcmask (!%p263_p2), 814162   ;;  %vm365_vm8 = vcmask (!%p263_p2), 805890   ;;  %vm372_vm9 = vcmask (!%p263_p2), 738304  }
   0x9   : > { %v320_v5 = vsub.s32 (!%p263_p2), 0, %v319_v3  ;;  %s792_s18 = smov (!%p263_p2), 119   ;;  %s793_s19 = smov (!%p263_p2), 118   ;;  %vm380_vm10 = vcmask (!%p263_p2), 732162   ;;  %vm387_vm11 = vcmask (!%p263_p2), 721920   ;;  %vm414_vm12 = vcmask (!%p263_p2), 1041408  }
   0xa   : > { %s794_s20 = smov (!%p263_p2), 117   ;;  %v389_v44 = vld [vmem:[%s918_s2] sm:$0xf] (!%p263_p2)  ;;  %vm410_vm13 = vcmask (!%p263_p2), 293888   ;;  %vm475_vm14 = vcmask (!%p263_p2), 814080   ;;  %vm489_vm15 = vcmask (!%p263_p2), 814160  }
   0xb   : > { %v858_v9 = vrot.slane (!%p263_p2), %v317_v4, %v320_v5  ;;  %v627_v1 = vld [vmem:[%s923_s7] sm:$0xff] (!%p263_p2)  ;;  %vm482_vm0 = vcmask (!%p263_p2), 814168   ;;  %vm519_vm3 = vcmask (!%p263_p2), 740352  }
   0xc   : > { %v620_v2 = vld [vmem:[%s922_s6] sm:$0xff] (!%p263_p2) }
   0xd   : > { %s926_s28 = smov (!%p295_p3, %s690_s28), 1  ;;  %vm322_vm1 = vcmp.eq.s32.totalorder %v858_v9, 1 }
   0xe   : > { %s713_s9 = sshll.u32 %s926_s28, 4 }
   0xf   : > { %s299_s12 = scalar_lea.vmem %s916_s0, %s713_s9 }
  0x10   : > { %v307_v6 = vld [vmem:[%s299_s12] sm:$0xf]  ;;  %v698_v7 = vld [vmem:[%s299_s12 + $0x4] sm:$0xf]  ;;  %v699_v8 = vld [vmem:[%s299_s12 + $0x8] sm:$0xf] }
  0x11   : > { %v310_v10 = vmax.f32 %v307_v6, %v698_v7  ;;  %v700_v11 = vld [vmem:[%s299_s12 + $0xc] sm:$0xf] }
  0x13   : > { %v313_v12 = vmax.f32 %v310_v10, %v699_v8 }
  0x15   : > { %v316_v13 = vmax.f32 %v313_v12, %v700_v11 }
  0x17   : > { %v323_v14 = vsel %vm322_vm1, %v316_v13, 0.0 }
  0x18   : > { %v324_v15 = vpack.c.bf16 %v323_v14, %v323_v14 }
  0x1a   : > { %326 = vst.msk [vmem:[#allocation2] sm:$0x3] %vm325_vm2, %v324_v15 }
  0x21   : > { %v342_v16 = vld [vmem:[#allocation2] sm:$0x3] }
  0x22   : > { %v357_v17 = vld [vmem:[#allocation2] sm:$0x3]  ;;  %344 = vrot.lane.b32.xlu1 %v342_v16, %s787_s13 }
  0x23   : > { %v327_v18 = vld [vmem:[#allocation2] sm:$0x3]  ;;  %358 = vst.msk [vmem:[#allocation3 + $0x8] sm:$0x3] %vm325_vm2, %v357_v17  ;;  %vm496_vm2 = vcmask 814152  }
  0x24   : > { %329 = vrot.lane.b32.xlu0 %v327_v18, %s788_s14  ;;  %v349_v20 = vld [vmem:[#allocation2] sm:$0x3] }
  0x25   : > { %v334_v21 = vld [vmem:[#allocation2] sm:$0x3]  ;;  %v351_v22 = vrot.slane %v349_v20, 6 }
  0x26   : > { %v336_v23 = vrot.slane %v334_v21, 6  ;;  %v359_v24 = vld [vmem:[#allocation2] sm:$0x3] }
  0x27   : > { %352 = vrot.lane.b32.xlu1 %v351_v22, %s789_s15  ;;  %v361_v25 = vrot.slane %v359_v24, 6  ;;  %v367_v26 = vld [vmem:[#allocation2] sm:$0x3] }
  0x28   : > { %337 = vrot.lane.b32.xlu0 %v336_v23, %s790_s16  ;;  %v374_v27 = vld [vmem:[#allocation2] sm:$0x3] }
  0x29   : > { %v376_v28 = vrot.slane %v374_v27, 6  ;;  %v382_v29 = vld [vmem:[#allocation2] sm:$0x3] }
  0x2a   : > { %v535_v17 = vld [vmem:[%s921_s5] sm:$0xf] }
  0x2b   : > { %369 = vrot.lane.b32.xlu1 %v367_v26, %s792_s18 }
  0x2c   : > { %362 = vrot.lane.b32.xlu0 %v361_v25, %s791_s17 }
  0x2f   : > { %384 = vrot.lane.b32.xlu1 %v382_v29, %s794_s20 }
  0x30   : > { %377 = vrot.lane.b32.xlu0 %v376_v28, %s793_s19 }
  0x33   : > { %468 = vperm.xlu1 %768, %v465_v31  }
  0x34   : > { %461 = vperm.xlu0 %767, %v458_v30  }
  0x94   : > { %v345_v32 = vpop.permute.xlu1 %344 }
  0x95   : > { %348 = vst.msk [vmem:[#allocation3 + $0x4] sm:$0x3] %vm347_vm4, %v345_v32  ;;  %vm512_vm4 = vcmask 805888  }
  0x96   : > { %v330_v33 = vpop.permute.xlu0 %329 }
  0x97   : > { %333 = vst.msk [vmem:[#allocation3] sm:$0x3] %vm332_vm5, %v330_v33  ;;  %vm533_vm5 = vcmask 723968  }
  0x99   : > { %v353_v34 = vpop.permute.xlu1 %352 }
  0x9a   : > { %v338_v35 = vpop.permute.xlu0 %337  ;;  %356 = vst.msk [vmem:[#allocation3 + $0x4] sm:$0xc] %vm355_vm6, %v353_v34  ;;  %vm526_vm6 = vcmask 732160  }
  0x9b   : > { %341 = vst.msk [vmem:[#allocation3] sm:$0xc] %vm340_vm7, %v338_v35  ;;  %vm576_vm7 = vcmask 1043456  }
  0x9d   : > { %v370_v37 = vpop.permute.xlu1 %369 }
  0x9e   : > { %v363_v36 = vpop.permute.xlu0 %362  ;;  %373 = vst.msk [vmem:[#allocation3 + $0xc] sm:$0x3] %vm372_vm9, %v370_v37  ;;  %vm635_vm9 = vcmask 818176  }
  0x9f   : > { %366 = vst.msk [vmem:[#allocation3 + $0x8] sm:$0xc] %vm365_vm8, %v363_v36  ;;  %vm572_vm8 = vcmask 588800  }
  0xa1   : > { %v385_v39 = vpop.permute.xlu1 %384 }
  0xa2   : > { %v378_v38 = vpop.permute.xlu0 %377  ;;  %v769_v40 = vld [vmem:[#allocation3] sm:$0xff]   ;;  %388 = vst.msk [vmem:[#allocation3 + $0x10] sm:$0x3] %vm387_vm11, %v385_v39 }
  0xa3   : > { %381 = vst.msk [vmem:[#allocation3 + $0xc] sm:$0xc] %vm380_vm10, %v378_v38  ;;  %725 = vmatpush3.bf16.msra.mxu0 %v769_v40 }
  0xa4   : > { %726 = vmatprep.subr.bf16.mxu0 %v786_v19 }
  0xa9   : > { %v771_v42 = vld [vmem:[#allocation3 + $0x10] ss:$0 sps:$4 sm:$0x33]  }
  0xaa   : > { %v770_v41 = vld [vmem:[#allocation3 + $0x8] sm:$0xff]   ;;  %v416_v43 = vsel %vm414_vm12, %v771_v42, 0 }
  0xab   : > { %727 = vmatpush3.bf16.msra.mxu0 %v770_v41 }
  0xac   : > { %728 = vmatprep.subr.bf16.mxu0 %v786_v19 }
  0xaf   : > { %729 = vmatpush3.bf16.msra.mxu0 %v416_v43 }
  0xb2   : > { %731 = vmatmul.mubr.msk.bf16.vlgmr.msra.gmra.mrb[0].mxu0 %vm410_vm13, %v389_v44  ;;  %v469_v47 = vpop.permute.xlu1 %468 }
  0xb3   : > { %v462_v45 = vpop.permute.xlu0 %461 }
 0x185   : > { %v452_v46 = vpop.f32.mrb[0].mxu0 }
 0x186   : > { %v464_v48 = vmul.f32 %v462_v45, %v452_v46  ;;  %v732_v49 = vpop.f32.mrb[1].mxu0 }
 0x187   : > { %v455_v50 = vpop.f32.mrb[2].mxu0 }
 0x188   : > { %v471_v51 = vadd.f32 %v469_v47, %v464_v48  ;;  %v733_v52 = vpop.f32.mrb[3].mxu0 }
 0x18a   : > { %v472_v53 = vmax.f32 %v471_v51, 0.0 }
 0x18c   : > { %v473_v54 = vsel %vm322_vm1, %v472_v53, 0.0  ;;  %vm503_vm1 = vcmask 814088  }
 0x18d   : > { %v474_v55 = vpack.c.bf16 %v473_v54, %v473_v54 }
 0x18f   : > { %476 = vst.msk [vmem:[#allocation2] sm:$0xf] %vm475_vm14, %v474_v55 }
 0x196   : > { %v484_v56 = vld [vmem:[#allocation2] sm:$0xf] }
 0x197   : > { %v477_v57 = vld [vmem:[#allocation2] sm:$0xf]  ;;  %486 = vrot.lane.b32.xlu0 %v484_v56, %s790_s16 }
 0x198   : > { %479 = vrot.lane.b32.xlu1 %v477_v57, %s788_s14  ;;  %v505_v58 = vld [vmem:[#allocation2] sm:$0xf] }
 0x199   : > { %v498_v59 = vld [vmem:[#allocation2] sm:$0xf]  ;;  %506 = vst.msk [vmem:[#allocation3 + $0x10] sm:$0xf] %vm475_vm14, %v505_v58 }
 0x19a   : > { %v491_v60 = vld [vmem:[#allocation2] sm:$0xf] }
 0x19b   : > { %500 = vrot.lane.b32.xlu0 %v498_v59, %s789_s15  ;;  %v514_v61 = vld [vmem:[#allocation2] sm:$0xf] }
 0x19c   : > { %493 = vrot.lane.b32.xlu1 %v491_v60, %s787_s13  ;;  %v507_v62 = vld [vmem:[#allocation2] sm:$0xf]  ;;  %s697_s13 = sshll.u32 %s926_s28, 3 }
 0x19d   : > { %v528_v63 = vld [vmem:[#allocation2] sm:$0xf]  ;;  %s303_s16 = scalar_lea.vmem %s924_s8, %s697_s13 }
 0x19e   : > { %v521_v0 = vld [vmem:[#allocation2] sm:$0xf] }
 0x19f   : > { %516 = vrot.lane.b32.xlu0 %v514_v61, %s792_s18 }
 0x1a0   : > { %509 = vrot.lane.b32.xlu1 %v507_v62, %s791_s17 }
 0x1a3   : > { %530 = vrot.lane.b32.xlu0 %v528_v63, %s794_s20 }
 0x1a4   : > { %523 = vrot.lane.b32.xlu1 %v521_v0, %s793_s19 }
 0x1a7   : > { %630 = vperm.xlu0 %767, %v627_v1  }
 0x1a8   : > { %623 = vperm.xlu1 %768, %v620_v2  }
 0x209   : > { %v487_v3 = vpop.permute.xlu0 %486 }
 0x20a   : > { %v480_v4 = vpop.permute.xlu1 %479  ;;  %490 = vst.msk [vmem:[#allocation3 + $0x4] sm:$0xf] %vm489_vm15, %v487_v3 }
 0x20b   : > { %483 = vst.msk [vmem:[#allocation3] sm:$0xf] %vm482_vm0, %v480_v4 }
 0x20d   : > { %v501_v5 = vpop.permute.xlu0 %500 }
 0x20e   : > { %v494_v6 = vpop.permute.xlu1 %493  ;;  %504 = vst.msk [vmem:[#allocation3 + $0xc] sm:$0xf] %vm503_vm1, %v501_v5 }
 0x20f   : > { %497 = vst.msk [vmem:[#allocation3 + $0x8] sm:$0xf] %vm496_vm2, %v494_v6 }
 0x211   : > { %v517_v7 = vpop.permute.xlu0 %516 }
 0x212   : > { %v510_v8 = vpop.permute.xlu1 %509  ;;  %v772_v9 = vld [vmem:[#allocation3] sm:$0xff]   ;;  %520 = vst.msk [vmem:[#allocation3 + $0x18] sm:$0xf] %vm519_vm3, %v517_v7 }
 0x213   : > { %513 = vst.msk [vmem:[#allocation3 + $0x14] sm:$0xf] %vm512_vm4, %v510_v8  ;;  %735 = vmatpush3.bf16.msra.mxu1 %v772_v9 }
 0x214   : > { %736 = vmatprep.subr.bf16.mxu1 %v786_v19 }
 0x215   : > { %v531_v10 = vpop.permute.xlu0 %530 }
 0x216   : > { %v524_v11 = vpop.permute.xlu1 %523  ;;  %v773_v12 = vld [vmem:[#allocation3 + $0x8] sm:$0xff]   ;;  %534 = vst.msk [vmem:[#allocation3 + $0x20] sm:$0xf] %vm533_vm5, %v531_v10 }
 0x217   : > { %527 = vst.msk [vmem:[#allocation3 + $0x1c] sm:$0xf] %vm526_vm6, %v524_v11  ;;  %737 = vmatpush3.bf16.msra.mxu1 %v773_v12 }
 0x218   : > { %738 = vmatprep.subr.bf16.mxu1 %v786_v19 }
 0x21a   : > { %v774_v13 = vld [vmem:[#allocation3 + $0x10] sm:$0xff]  }
 0x21b   : > { %739 = vmatpush3.bf16.msra.mxu1 %v774_v13 }
 0x21c   : > { %740 = vmatprep.subr.bf16.mxu1 %v786_v19 }
 0x21d   : > { %v776_v15 = vld [vmem:[#allocation3 + $0x20] ss:$0 sps:$4 sm:$0xff]  }
 0x21e   : > { %v775_v14 = vld [vmem:[#allocation3 + $0x18] sm:$0xff]   ;;  %v578_v16 = vsel %vm576_vm7, %v776_v15, 0 }
 0x21f   : > { %741 = vmatpush3.bf16.msra.mxu1 %v775_v14 }
 0x220   : > { %742 = vmatprep.subr.bf16.mxu1 %v786_v19 }
 0x223   : > { %743 = vmatpush3.bf16.msra.mxu1 %v578_v16 }
 0x226   : > { %745 = vmatmul.mubr.msk.bf16.vlgmr.msra.gmra.mrb[0].mxu1 %vm572_vm8, %v535_v17  ;;  %v631_v23 = vpop.permute.xlu0 %630 }
 0x227   : > { %v624_v18 = vpop.permute.xlu1 %623 }
 0x2f9   : > { %v614_v20 = vpop.f32.mrb[0].mxu1 }
 0x2fa   : > { %v626_v21 = vmul.f32 %v624_v18, %v614_v20  ;;  %v746_v22 = vpop.f32.mrb[1].mxu1 }
 0x2fb   : > { %v617_v24 = vpop.f32.mrb[2].mxu1 }
 0x2fc   : > { %v633_v25 = vadd.f32 %v631_v23, %v626_v21  ;;  %v747_v26 = vpop.f32.mrb[3].mxu1 }
 0x2fe   : > { %v634_v19 = vmax.f32 %v633_v25, 0.0 }
 0x300   : > { %636 = vst.msk [vmem:[%s303_s16] sm:$0xff] %vm635_vm9, %v634_v19 }
 0x301 PF: > { %s18_s27 = sadd.s32 1, %s783_s27  }
 0x302   : > { %p15_p4 = scmp.ge.s32.totalorder %s18_s27, 4  }
 0x304   :  { %17 = sbr.rel (!%p15_p4) target bundleno = 1 (0x1), region = 85 }

</bundles_post_ra>
